<compile_context>
chip_gen: v7x
topology: tpu7x:2x2x1
jax: 0.10.0
libtpu: 0.0.40
codegen_flags: <defaults>
</compile_context>

<pallas_src>
import jax
import jax.numpy as jnp
from jax.experimental import pallas as pl
from jax.experimental.pallas import tpu as pltpu

SUBLANE = 8  # sublane granularity for f32 row tiles


def _round_up(x, m):
    return (x + m - 1) // m * m


def _mlp_kernel(x_ref, w1_ref, b1_ref, w2_ref, b2_ref, o_ref):
    # In-kernel bf16 cast of x (saves a separate XLA cast pass over HBM).
    x = x_ref[...].astype(jnp.bfloat16)
    # fc1: (tm, d_in)bf16 @ (d_in, hidden)bf16 -> f32 accumulation on the MXU.
    h = jnp.dot(x, w1_ref[...], preferred_element_type=jnp.float32)
    # bias + ReLU in f32 (v5e-safe epilogue).
    h = jnp.maximum(h + b1_ref[...], 0.0)
    # Dropout (eval/inference mode) -> identity.
    # fc2: (tm, hidden)bf16 @ (hidden, n_classes)bf16 -> f32.
    out = jnp.dot(h.astype(jnp.bfloat16), w2_ref[...],
                  preferred_element_type=jnp.float32)
    o_ref[...] = (out + b2_ref[...]).astype(o_ref.dtype)


def classification_head(x, w1, b1, w2, b2, *, tm=1024,
                        min_pallas_batch=256, force_pallas=False):
    """
    x  : (B, d_in)            float32
    w1 : (d_in, hidden)       float32   (transpose of torch fc1.weight)
    b1 : (hidden,) or (1,hidden)
    w2 : (hidden, n_classes)  float32   (transpose of torch fc2.weight)
    b2 : (n_classes,) or (1,n_classes)
    returns (B, n_classes)    float32
    """
    B, d_in = x.shape
    hidden = w1.shape[1]
    n_classes = w2.shape[1]

    b1 = jnp.asarray(b1, jnp.float32).reshape(1, hidden)
    b2 = jnp.asarray(b2, jnp.float32).reshape(1, n_classes)
    x = x.astype(jnp.float32)

    if B < min_pallas_batch and not force_pallas:
        # Tiny batches: launch + pipeline prologue dwarfs the math; let XLA
        # fuse the head into the producer of x instead.
        h = jnp.maximum(x @ w1 + b1, 0.0)
        return h @ w2 + b2

    # --- row-tile choice ---------------------------------------------------
    # Cap so large batches get >= 4 grid steps (v7x megacore + DMA overlap),
    # then split B evenly (bounds pad waste to < one tile instead of up to 2x).
    tm_cap = max(SUBLANE, min(tm, _round_up(pl.cdiv(B, 4), SUBLANE)))
    n_steps = pl.cdiv(B, tm_cap)
    tm_eff = _round_up(pl.cdiv(B, n_steps), SUBLANE)
    if tm_eff >= B:
        tm_eff = B                      # single full-extent block
    grid = (pl.cdiv(B, tm_eff),)        # partial last block handled by Pallas

    w1_b = w1.astype(jnp.bfloat16)
    w2_b = w2.astype(jnp.bfloat16)

    cost = pl.CostEstimate(
        flops=2 * B * d_in * hidden + 2 * B * hidden * n_classes,
        transcendentals=0,
        bytes_accessed=(B * d_in * 4 + w1_b.size * 2 + w2_b.size * 2
                        + b1.size * 4 + b2.size * 4 + B * n_classes * 4),
    )

    return pl.pallas_call(
        _mlp_kernel,
        out_shape=jax.ShapeDtypeStruct((B, n_classes), jnp.float32),
        grid=grid,
        in_specs=[
            # x streams through the batch grid (f32, cast in-kernel)
            pl.BlockSpec((tm_eff, d_in), lambda i: (i, 0)),
            # weights / biases: constant index_map -> resident in VMEM
            pl.BlockSpec((d_in, hidden), lambda i: (0, 0)),
            pl.BlockSpec((1, hidden), lambda i: (0, 0)),
            pl.BlockSpec((hidden, n_classes), lambda i: (0, 0)),
            pl.BlockSpec((1, n_classes), lambda i: (0, 0)),
        ],
        out_specs=pl.BlockSpec((tm_eff, n_classes), lambda i: (i, 0)),
        compiler_params=pltpu.CompilerParams(
            dimension_semantics=("parallel",)),
        cost_estimate=cost,
    )(x, w1_b, b1, w2_b, b2)


def _reference_bf16(x, w1, b1, w2, b2):
    """Matches the kernel's numerics (bf16 MXU inputs, f32 accumulation)."""
    xb = x.astype(jnp.bfloat16)
    w1b = w1.astype(jnp.bfloat16)
    w2b = w2.astype(jnp.bfloat16)
    h = jnp.dot(xb, w1b, preferred_element_type=jnp.float32) + b1.reshape(1, -1)
    h = jnp.maximum(h, 0.0)
    return jnp.dot(h.astype(jnp.bfloat16), w2b,
                   preferred_element_type=jnp.float32) + b2.reshape(1, -1)


def _reference_f32(x, w1, b1, w2, b2):
    h = jnp.maximum(x @ w1 + b1.reshape(1, -1), 0.0)
    return h @ w2 + b2.reshape(1, -1)


def _make_params(key, d_in, hidden, n_classes):
    kw1, kb1, kw2, kb2 = jax.random.split(key, 4)
    bound1 = 1.0 / (d_in ** 0.5)
    bound2 = 1.0 / (hidden ** 0.5)
    w1 = jax.random.uniform(kw1, (d_in, hidden), jnp.float32, -bound1, bound1)
    b1 = jax.random.uniform(kb1, (hidden,), jnp.float32, -bound1, bound1)
    w2 = jax.random.uniform(kw2, (hidden, n_classes), jnp.float32, -bound2, bound2)
    b2 = jax.random.uniform(kb2, (n_classes,), jnp.float32, -bound2, bound2)
    return w1, b1, w2, b2


if __name__ == "__main__":
    # Shapes implied by the module defaults: d_in=64, hidden=64, n_classes=10.
    d_in, hidden, n_classes = 64, 64, 10
    key = jax.random.PRNGKey(0)
    kparams, kx1, kx2 = jax.random.split(key, 3)
    w1, b1, w2, b2 = _make_params(kparams, d_in, hidden, n_classes)

    # --- check 1: module-default tiny batch (force the Pallas path) --------
    B = 2
    x = jax.random.normal(kx1, (B, d_in), dtype=jnp.float32)
    out = classification_head(x, w1, b1, w2, b2, force_pallas=True)
    out = jax.block_until_ready(out)
    assert out.shape == (B, n_classes), out.shape
    assert jnp.allclose(out, _reference_bf16(x, w1, b1, w2, b2),
                        atol=2e-3, rtol=2e-3), "mismatch vs bf16 reference (B=2)"
    assert jnp.allclose(out, _reference_f32(x, w1, b1, w2, b2),
                        atol=5e-2, rtol=5e-2), "mismatch vs f32 reference (B=2)"

    # --- check 2: multi-step grid with a partial last block ----------------
    B2 = 300
    x2 = jax.random.normal(kx2, (B2, d_in), dtype=jnp.float32)
    out2 = classification_head(x2, w1, b1, w2, b2)
    out2 = jax.block_until_ready(out2)
    assert out2.shape == (B2, n_classes), out2.shape
    assert jnp.allclose(out2, _reference_bf16(x2, w1, b1, w2, b2),
                        atol=2e-3, rtol=2e-3), "mismatch vs bf16 reference (B=300)"
    assert jnp.allclose(out2, _reference_f32(x2, w1, b1, w2, b2),
                        atol=5e-2, rtol=5e-2), "mismatch vs f32 reference (B=300)"

    print("KERNEL_OK")
</pallas_src>

<mosaic_0001>
module attributes {stable_mosaic.version = 11 : i64} {
  func.func @_mlp_kernel(%arg0: i32, %arg1: memref<2x64xf32, #tpu.memory_space<vmem>>, %arg2: memref<64x64xbf16, #tpu.memory_space<vmem>>, %arg3: memref<1x64xf32, #tpu.memory_space<vmem>>, %arg4: memref<64x10xbf16, #tpu.memory_space<vmem>>, %arg5: memref<1x10xf32, #tpu.memory_space<vmem>>, %arg6: memref<2x10xf32, #tpu.memory_space<vmem>>) attributes {dimension_semantics = [#tpu.dimension_semantics<parallel>], iteration_bounds = array<i64: 1>, scalar_prefetch = 0 : i64, scratch_operands = 0 : i64, tpu.core_type = #tpu.core_type<tc>, window_params = [{transform_indices = @transform_0, window_bounds = array<i64: 2, 64>}, {pipeline_mode = #tpu.pipeline_mode<synchronous>, transform_indices = @transform_1, window_bounds = array<i64: 64, 64>}, {pipeline_mode = #tpu.pipeline_mode<synchronous>, transform_indices = @transform_2, window_bounds = array<i64: 1, 64>}, {pipeline_mode = #tpu.pipeline_mode<synchronous>, transform_indices = @transform_3, window_bounds = array<i64: 64, 10>}, {pipeline_mode = #tpu.pipeline_mode<synchronous>, transform_indices = @transform_4, window_bounds = array<i64: 1, 10>}, {transform_indices = @transform_5, window_bounds = array<i64: 2, 10>}]} {
    %c0 = arith.constant 0 : index
    %c0_0 = arith.constant 0 : index
    %0 = vector.load %arg1[%c0, %c0_0] : memref<2x64xf32, #tpu.memory_space<vmem>>, vector<2x64xf32>
    %1 = arith.truncf %0 : vector<2x64xf32> to vector<2x64xbf16>
    %c0_1 = arith.constant 0 : index
    %c0_2 = arith.constant 0 : index
    %2 = vector.load %arg2[%c0_1, %c0_2] : memref<64x64xbf16, #tpu.memory_space<vmem>>, vector<64x64xbf16>
    %cst = arith.constant dense<0.000000e+00> : vector<2x64xf32>
    %3 = tpu.matmul %1, %2, %cst {dimension_numbers = #tpu.dot_dimension_numbers<[1], [0], [0], [1], [0, 0, 1, 1], [], []>} : vector<2x64xbf16>, vector<64x64xbf16>, vector<2x64xf32> -> vector<2x64xf32>
    %c0_3 = arith.constant 0 : index
    %c0_4 = arith.constant 0 : index
    %4 = vector.load %arg3[%c0_3, %c0_4] : memref<1x64xf32, #tpu.memory_space<vmem>>, vector<1x64xf32>
    %5 = vector.broadcast %4 : vector<1x64xf32> to vector<2x64xf32>
    %6 = arith.addf %3, %5 : vector<2x64xf32>
    %cst_5 = arith.constant 0.000000e+00 : f32
    %7 = vector.broadcast %cst_5 : f32 to vector<2x64xf32>
    %8 = arith.maximumf %6, %7 : vector<2x64xf32>
    %9 = arith.truncf %8 : vector<2x64xf32> to vector<2x64xbf16>
    %c0_6 = arith.constant 0 : index
    %c0_7 = arith.constant 0 : index
    %10 = vector.load %arg4[%c0_6, %c0_7] : memref<64x10xbf16, #tpu.memory_space<vmem>>, vector<64x10xbf16>
    %cst_8 = arith.constant dense<0.000000e+00> : vector<2x10xf32>
    %11 = tpu.matmul %9, %10, %cst_8 {dimension_numbers = #tpu.dot_dimension_numbers<[1], [0], [0], [1], [0, 0, 1, 1], [], []>} : vector<2x64xbf16>, vector<64x10xbf16>, vector<2x10xf32> -> vector<2x10xf32>
    %c0_9 = arith.constant 0 : index
    %c0_10 = arith.constant 0 : index
    %12 = vector.load %arg5[%c0_9, %c0_10] : memref<1x10xf32, #tpu.memory_space<vmem>>, vector<1x10xf32>
    %13 = vector.broadcast %12 : vector<1x10xf32> to vector<2x10xf32>
    %14 = arith.addf %11, %13 : vector<2x10xf32>
    %c0_11 = arith.constant 0 : index
    %c0_12 = arith.constant 0 : index
    %15 = vector.load %arg6[%c0_11, %c0_12] : memref<2x10xf32, #tpu.memory_space<vmem>>, vector<2x10xf32>
    tpu.vector_store %arg6[%c0_11, %c0_12], %14 {strides = array<i32>} : memref<2x10xf32, #tpu.memory_space<vmem>>, vector<2x10xf32>,
    return
  }
  func.func @transform_0(%arg0: i32) -> (i32, i32) {
    %c0_i32 = arith.constant 0 : i32
    %c0_i32_0 = arith.constant 0 : i32
    return %arg0, %c0_i32 : i32, i32
  }
  func.func @transform_1(%arg0: i32) -> (i32, i32) {
    %c0_i32 = arith.constant 0 : i32
    %c0_i32_0 = arith.constant 0 : i32
    %c0_i32_1 = arith.constant 0 : i32
    return %c0_i32, %c0_i32_0 : i32, i32
  }
  func.func @transform_2(%arg0: i32) -> (i32, i32) {
    %c0_i32 = arith.constant 0 : i32
    %c0_i32_0 = arith.constant 0 : i32
    %c0_i32_1 = arith.constant 0 : i32
    return %c0_i32, %c0_i32_0 : i32, i32
  }
  func.func @transform_3(%arg0: i32) -> (i32, i32) {
    %c0_i32 = arith.constant 0 : i32
    %c0_i32_0 = arith.constant 0 : i32
    %c0_i32_1 = arith.constant 0 : i32
    return %c0_i32, %c0_i32_0 : i32, i32
  }
  func.func @transform_4(%arg0: i32) -> (i32, i32) {
    %c0_i32 = arith.constant 0 : i32
    %c0_i32_0 = arith.constant 0 : i32
    %c0_i32_1 = arith.constant 0 : i32
    return %c0_i32, %c0_i32_0 : i32, i32
  }
  func.func @transform_5(%arg0: i32) -> (i32, i32) {
    %c0_i32 = arith.constant 0 : i32
    %c0_i32_0 = arith.constant 0 : i32
    return %arg0, %c0_i32 : i32, i32
  }
}

</mosaic_0001>

<bundles_post_ra>
// kernel: tpu_custom_call.1
= control target key start
LH: loop header
LB: loop body
LE: loop exit
PB: predicated region body
PF: predicated region fallthrough
CT: control target
= control target key end

     0   :  { %v288_v1 = vmov 0.0   ;;  %vm289_vm0 = vmmov 0   ;;  %s366_s0 = inlined_call_operand.vmem [shape: f32[2,64], index: 0, kind: input, shape index: {}]   ;;  %s367_s1 = inlined_call_operand.vmem [shape: bf16[64,64], index: 1, kind: input, shape index: {}]   ;;  %s368_s2 = inlined_call_operand.vmem [shape: f32[1,64], index: 2, kind: input, shape index: {}]   ;;  %s369_s3 = inlined_call_operand.vmem [shape: bf16[64,10], index: 3, kind: input, shape index: {}]   ;;  %s370_s4 = inlined_call_operand.vmem [shape: f32[1,10], index: 4, kind: input, shape index: {}]   ;;  %s371_s5 = inlined_call_operand.hbm [shape: f32[2,10], index: 5, kind: output, shape index: {}]  }
   0x1   :  { %v256_v0 = vld [vmem:[%s367_s1] sm:$0xff]   ;;  %229 = vmatprep.subr.bf16.mxu0 %v288_v1  ;;  %241 = vmatprep.subr.bf16.mxu1 %v288_v1  ;;  %v257_v2 = vld [vmem:[%s367_s1 + $0x8] sm:$0xff]   ;;  %v258_v4 = vld [vmem:[%s367_s1 + $0x10] sm:$0xff]  }
   0x2   :  { %230 = vmatpush3.bf16.msra.mxu0 %v256_v0  ;;  %237 = vmatprep.mubr.msk.bf16.mxu0 %vm289_vm0, %v288_v1  ;;  %v260_v3 = vld [vmem:[%s369_s3] sm:$0xff]   ;;  %v261_v5 = vld [vmem:[%s369_s3 + $0x8] sm:$0xff]  }
   0x3   :  { %231 = vmatprep.subr.bf16.mxu0 %v288_v1  ;;  %249 = vmatprep.mubr.msk.bf16.mxu1 %vm289_vm0, %v288_v1 }
   0x4   :  { %242 = vmatpush3.bf16.msra.mxu1 %v260_v3 }
   0x5   :  { %243 = vmatprep.subr.bf16.mxu1 %v288_v1 }
   0x6   :  { %232 = vmatpush3.bf16.msra.mxu0 %v257_v2 }
   0x7   :  { %233 = vmatprep.subr.bf16.mxu0 %v288_v1 }
   0x8   :  { %10 = vsyncpa [#allocation3], 0  ;;  %v259_v6 = vld [vmem:[%s367_s1 + $0x18] sm:$0xff]   ;;  %v22_v7 = vld [vmem:[%s366_s0] sm:$0x3]  ;;  %244 = vmatpush3.bf16.msra.mxu1 %v261_v5  ;;  %vm63_vm1 = vcmask 523264  }
   0x9   :  { %245 = vmatprep.subr.bf16.mxu1 %v288_v1  ;;  %v23_v8 = vpack.c.bf16 %v22_v7, %v22_v7  ;;  %v262_v9 = vld [vmem:[%s369_s3 + $0x10] sm:$0xff]   ;;  %v263_v10 = vld [vmem:[%s369_s3 + $0x18] sm:$0xff]   ;;  %v207_v11 = vld [vmem:[%s368_s2] ss:$0 sm:$0xff]  ;;  %s290_s13 = smov [#allocation2]   ;;  %vm191_vm2 = vcmask 74752  }
   0xa   :  { %234 = vmatpush3.bf16.msra.mxu0 %v258_v4  ;;  %v213_v19 = vld [vmem:[%s370_s4] ss:$0 sm:$0xff]  ;;  %s199_s14 = sshll.u32 %s290_s13, 4  ;;  %s200_s14 = int_to_ptr.vmem [resolvable:$true] %s199_s14 }
   0xb   :  { %235 = vmatprep.subr.bf16.mxu0 %v288_v1  ;;  %s264_s2 = scalar_lea.vmem %s200_s14, 32  ;;  %p269_p1 = scmp.lt.s32.totalorder %s200_s14, %s200_s14 }
   0xc   :  { %246 = vmatpush3.bf16.msra.mxu1 %v262_v9  ;;  %p265_p0 = scmp.ne.s32.totalorder %s200_s14, %s264_s2  ;;  %p270_p2 = scmp.lt.s32.totalorder %s264_s2, %s264_s2 }
   0xd   :  { %247 = vmatprep.subr.bf16.mxu1 %v288_v1 }
   0xe   :  { %236 = vmatpush3.bf16.msra.mxu0 %v259_v6  ;;  %p271_p3 = por %p270_p2, %p269_p1 }
  0x10   :  { %248 = vmatpush3.bf16.msra.mxu1 %v263_v10  ;;  %p272_p4 = pnand %p271_p3, %p265_p0 }
  0x11   :  { %238 = vmatmul.mubr.msk.bf16.vlgmr.msra.gmra.mrb[0].mxu0 %vm63_vm1, %v23_v8 }
  0xe4   :  { %v101_v12 = vpop.f32.mrb[0].mxu0 }
  0xe5   :  { %v102_v13 = vadd.f32 %v207_v11, %v101_v12  ;;  %v239_v14 = vpop.f32.mrb[1].mxu0 }
  0xe6   :  { %v104_v15 = vpop.f32.mrb[2].mxu0 }
  0xe7   :  { %v107_v16 = vmax.f32 %v102_v13, 0.0  ;;  %v240_v17 = vpop.f32.mrb[3].mxu0 }
  0xe9   :  { %v108_v18 = vpack.c.bf16 %v107_v16, %v107_v16 }
  0xeb   :  { %250 = vmatmul.mubr.msk.bf16.vlgmr.msra.gmra.mrb[0].mxu1 %vm63_vm1, %v108_v18 }
 0x1be   :  { %v185_v20 = vpop.f32.mrb[0].mxu1 }
 0x1bf   :  { %v186_v21 = vadd.f32 %v213_v19, %v185_v20  ;;  %v251_v22 = vpop.f32.mrb[1].mxu1 }
 0x1c0   :  { %v188_v23 = vpop.f32.mrb[2].mxu1 }
 0x1c1   :  { %v252_v24 = vpop.f32.mrb[3].mxu1  ;;  %192 = vst.msk [vmem:[#allocation2] sm:$0x3] %vm191_vm2, %v186_v21 }
 0x1c2   :  { %275 = shalt.err (!%p272_p4)
}
 0x1c3   :  { %s276_s4 = scalar_lea.hbm %s371_s5, 32 }
 0x1c4   :  { %p277_p5 = scmp.ne.s32.totalorder %s371_s5, %s276_s4  ;;  %p280_p6 = scmp.lt.u32.totalorder %s276_s4, %s371_s5 }
 0x1c6   :  { %p282_p7 = pnand %p280_p6, %p277_p5 }
 0x1c8   :  { %285 = shalt.err (!%p282_p7)
}
 0x1c9   :  { %202 = dma.vmem_to_hbm [thread:$0]  %s200_s14, 32, %s371_s5, [#allocation3]  }
 0x1ca   :  { %286 = dma.done.wait [#allocation3], 32  }
 0x1cb   :  { %287 = vsyncadd [#allocation3], 4294967264 }
 0x1cc   :  { %206 = vsyncpa [#allocation3], 1 }

</bundles_post_ra>
